<compile_context>
chip_gen: v6e
topology: v6e:2x2x1
jax: 0.10.0
libtpu: 0.0.40
codegen_flags: <defaults>
</compile_context>

<pallas_src>
import functools

import jax
import jax.numpy as jnp
from jax.experimental import pallas as pl
from jax.experimental.pallas import tpu as pltpu


def _round_up(a, b):
    return (a + b - 1) // b * b


def _cdiv(a, b):
    return -(-a // b)


def _patch_embed_kernel(x_ref, w_ref, b_ref, o_ref):
    # x_ref: (TM, K) patch tile, w_ref: (K, TN), b_ref: (1, TN) f32, o_ref: (TM, TN)
    acc = jnp.dot(x_ref[...], w_ref[...], preferred_element_type=jnp.float32)
    o_ref[...] = (acc + b_ref[...]).astype(o_ref.dtype)


def patch_embedding_forward(x, conv_weight, conv_bias, patch_size,
                            *, compute_dtype=None, out_dtype=None):
    """ViT patch embedding: Conv2d(k=s=p) -> flatten(2) -> transpose(1, 2).

    x: (B, C, H, W) NCHW; conv_weight: (E, C, p, p); conv_bias: (E,).
    Returns (B, num_patches, E).
    """
    B, C, H, W = x.shape
    E = conv_weight.shape[0]
    p = patch_size
    Hp, Wp = H // p, W // p
    num_patches = Hp * Wp
    out_dtype = x.dtype if out_dtype is None else jnp.dtype(out_dtype)

    # --- glue: extract non-overlapping patches; per-patch flatten order is
    # (C, ph, pw), matching conv_weight.reshape(E, -1).
    patches = x.reshape(B, C, Hp, p, Wp, p)
    patches = patches.transpose(0, 2, 4, 1, 3, 5)            # (B, Hp, Wp, C, p, p)
    patches = patches.reshape(B * num_patches, C * p * p)    # (M, K)
    w = conv_weight.reshape(E, C * p * p).T                  # (K, E)
    b = conv_bias.reshape(1, E).astype(jnp.float32)          # bias stays f32

    if compute_dtype is not None:                            # bf16 on v6e/v7x in prod
        patches = patches.astype(compute_dtype)
        w = w.astype(compute_dtype)

    M, K = patches.shape
    in_bytes = patches.dtype.itemsize
    out_bytes = out_dtype.itemsize

    # Sublane quantum for the M (second-to-last) block dim: 8 for 32-bit,
    # 16 for 16-bit, 32 for 8-bit operands/outputs.
    sub = max(32 // in_bytes, 32 // out_bytes, 8)

    # K: keep natural size (full-extent last dim of the patch block); pad only
    # to a multiple of 8 so the weight's sublane dim is clean.  No 128 padding.
    K_pad = _round_up(K, 8)

    # N: single lane-dense tile covering the whole embed dim whenever the
    # (double-buffered) weight fits comfortably in VMEM — the normal ViT case.
    # Fallback: 512-lane tiles (two full 256-wide MXU passes on v6e/v7x).
    N0 = _round_up(E, 128)
    if 2 * K_pad * N0 * in_bytes <= 8 * 1024 * 1024:
        TN = N0
    else:
        TN = 512
    N_pad = _round_up(E, TN)
    gn = N_pad // TN

    # M tile: as deep as the VMEM budget allows (hides DMA, amortizes per-step
    # overhead), capped at 2048 rows, split evenly so M padding stays small.
    vmem_budget = 26 * 1024 * 1024                        # headroom under v7x's 32 MiB scoped
    fixed = 2 * K_pad * TN * in_bytes + 2 * TN * 4        # weight + bias (double-buffered)
    per_row = 2 * (K_pad * in_bytes + TN * out_bytes)     # double-buffered input + output
    tm_budget = max(sub, (vmem_budget - fixed) // per_row // sub * sub)
    M_sub = _round_up(M, sub)
    TM_cap = max(sub, min(2048, tm_budget, M_sub))
    gm = _cdiv(M_sub, TM_cap)
    TM = _round_up(_cdiv(M, gm), sub)
    M_pad = TM * gm

    # Pad only when required (jnp.pad is the usual blocker for fusing the
    # patch-extraction chain into the kernel's input DMA).
    if (M_pad - M) or (K_pad - K):
        patches = jnp.pad(patches, ((0, M_pad - M), (0, K_pad - K)))
    if (K_pad - K) or (N_pad - E):
        w = jnp.pad(w, ((0, K_pad - K), (0, N_pad - E)))
    if N_pad - E:
        b = jnp.pad(b, ((0, 0), (0, N_pad - E)))

    grid_spec = pltpu.PrefetchScalarGridSpec(
        num_scalar_prefetch=0,
        # N tiles outer (usually gn == 1), M tiles inner: the weight/bias block
        # indices never change along the inner M axis, so they are fetched once
        # per N tile and stay VMEM-resident while the patch stream is
        # double-buffered against MXU compute.
        grid=(gn, gm),
        in_specs=[
            pl.BlockSpec((TM, K_pad), lambda j, i: (i, 0)),
            pl.BlockSpec((K_pad, TN), lambda j, i: (0, j)),
            pl.BlockSpec((1, TN), lambda j, i: (0, j)),
        ],
        out_specs=pl.BlockSpec((TM, TN), lambda j, i: (i, j)),
    )

    out = pl.pallas_call(
        _patch_embed_kernel,
        out_shape=jax.ShapeDtypeStruct((M_pad, N_pad), out_dtype),
        grid_spec=grid_spec,
        compiler_params=pltpu.CompilerParams(
            # No reduction axis -> both axes shard across TensorCores on v7x
            # (needs gm >= 2 to engage); harmless no-op on v5e/v6e.
            dimension_semantics=("parallel", "parallel"),
            # Let XLA fuse the reshape/transpose producing `patches` into the
            # kernel's input DMA instead of materializing an extra HBM copy.
            allow_input_fusion=[True, False, False],
            # Raise the scoped VMEM limit (v5e default is only 16 MiB); actual
            # usage is kept <= ~26 MiB, inside v7x's 64 MiB physical VMEM.
            vmem_limit_bytes=64 * 1024 * 1024,
        ),
        cost_estimate=pl.CostEstimate(
            flops=2 * M_pad * K_pad * N_pad,
            transcendentals=0,
            bytes_accessed=in_bytes * (M_pad * K_pad + K_pad * N_pad)
            + 4 * N_pad + out_bytes * M_pad * N_pad,
        ),
    )(patches, w, b)

    return out[:M, :E].reshape(B, num_patches, E)


if __name__ == "__main__":
    # Small config consistent with the PyTorch module (defaults: p=4, C=3, E=128).
    image_size, patch_size, in_channels, embed_dim = 16, 4, 3, 128

    key = jax.random.PRNGKey(0)
    kx, kw, kb = jax.random.split(key, 3)

    conv_weight = jax.random.normal(
        kw, (embed_dim, in_channels, patch_size, patch_size), jnp.float32) * 0.02
    conv_bias = jax.random.normal(kb, (embed_dim,), jnp.float32) * 0.02
    x = jax.random.normal(kx, (2, in_channels, image_size, image_size), jnp.float32)

    # f32 self-test (compute_dtype=jnp.bfloat16 / out_dtype=jnp.bfloat16 are the
    # recommended production settings on v6e/v7x but change numerics).
    fwd = jax.jit(functools.partial(patch_embedding_forward, patch_size=patch_size))
    out = jax.block_until_ready(fwd(x, conv_weight, conv_bias))

    # Reference: strided conv == einsum over extracted patches.
    Hp = Wp = image_size // patch_size
    ref_patches = x.reshape(2, in_channels, Hp, patch_size, Wp, patch_size)
    ref_patches = ref_patches.transpose(0, 2, 4, 1, 3, 5).reshape(
        2, Hp * Wp, in_channels * patch_size * patch_size)
    ref = jnp.einsum("bpk,ek->bpe", ref_patches,
                     conv_weight.reshape(embed_dim, -1)) + conv_bias

    assert out.shape == (2, Hp * Wp, embed_dim)
    assert jnp.allclose(out, ref, atol=1e-4, rtol=1e-4)
    print("KERNEL_OK")
</pallas_src>

<mosaic_0001>
module attributes {stable_mosaic.version = 11 : i64} {
  func.func @_patch_embed_kernel(%arg0: i32, %arg1: i32, %arg2: memref<32x48xf32, #tpu.memory_space<vmem>>, %arg3: memref<48x128xf32, #tpu.memory_space<vmem>>, %arg4: memref<1x128xf32, #tpu.memory_space<vmem>>, %arg5: memref<32x128xf32, #tpu.memory_space<vmem>>) attributes {dimension_semantics = [#tpu.dimension_semantics<parallel>, #tpu.dimension_semantics<parallel>], iteration_bounds = array<i64: 1, 1>, scalar_prefetch = 0 : i64, scratch_operands = 0 : i64, tpu.core_type = #tpu.core_type<tc>, window_params = [{transform_indices = @transform_0, window_bounds = array<i64: 32, 48>}, {transform_indices = @transform_1, window_bounds = array<i64: 48, 128>}, {transform_indices = @transform_2, window_bounds = array<i64: 1, 128>}, {transform_indices = @transform_3, window_bounds = array<i64: 32, 128>}]} {
    %c0 = arith.constant 0 : index
    %c0_0 = arith.constant 0 : index
    %0 = vector.load %arg2[%c0, %c0_0] : memref<32x48xf32, #tpu.memory_space<vmem>>, vector<32x48xf32>
    %c0_1 = arith.constant 0 : index
    %c0_2 = arith.constant 0 : index
    %1 = vector.load %arg3[%c0_1, %c0_2] : memref<48x128xf32, #tpu.memory_space<vmem>>, vector<48x128xf32>
    %cst = arith.constant dense<0.000000e+00> : vector<32x128xf32>
    %2 = tpu.matmul %0, %1, %cst {dimension_numbers = #tpu.dot_dimension_numbers<[1], [0], [0], [1], [0, 0, 1, 1], [], []>} : vector<32x48xf32>, vector<48x128xf32>, vector<32x128xf32> -> vector<32x128xf32>
    %c0_3 = arith.constant 0 : index
    %c0_4 = arith.constant 0 : index
    %3 = vector.load %arg4[%c0_3, %c0_4] : memref<1x128xf32, #tpu.memory_space<vmem>>, vector<1x128xf32>
    %4 = vector.broadcast %3 : vector<1x128xf32> to vector<32x128xf32>
    %5 = arith.addf %2, %4 : vector<32x128xf32>
    %c0_5 = arith.constant 0 : index
    %c0_6 = arith.constant 0 : index
    %6 = vector.load %arg5[%c0_5, %c0_6] : memref<32x128xf32, #tpu.memory_space<vmem>>, vector<32x128xf32>
    tpu.vector_store %arg5[%c0_5, %c0_6], %5 {strides = array<i32>} : memref<32x128xf32, #tpu.memory_space<vmem>>, vector<32x128xf32>,
    return
  }
  func.func @transform_0(%arg0: i32, %arg1: i32) -> (i32, i32) {
    %c0_i32 = arith.constant 0 : i32
    %c0_i32_0 = arith.constant 0 : i32
    return %arg1, %c0_i32 : i32, i32
  }
  func.func @transform_1(%arg0: i32, %arg1: i32) -> (i32, i32) {
    %c0_i32 = arith.constant 0 : i32
    %c0_i32_0 = arith.constant 0 : i32
    return %c0_i32, %arg0 : i32, i32
  }
  func.func @transform_2(%arg0: i32, %arg1: i32) -> (i32, i32) {
    %c0_i32 = arith.constant 0 : i32
    %c0_i32_0 = arith.constant 0 : i32
    return %c0_i32, %arg0 : i32, i32
  }
  func.func @transform_3(%arg0: i32, %arg1: i32) -> (i32, i32) {
    %c0_i32 = arith.constant 0 : i32
    return %arg1, %arg0 : i32, i32
  }
}

</mosaic_0001>

<bundles_post_ra>
// kernel: patch_embedding_forward.1
= control target key start
LH: loop header
LB: loop body
LE: loop exit
PB: predicated region body
PF: predicated region fallthrough
CT: control target
= control target key end

     0   :  { %s279_s0 = inlined_call_operand.vmem [shape: f32[32,48], index: 0, kind: input, shape index: {}]   ;;  %s280_s1 = inlined_call_operand.vmem [shape: f32[48,128], index: 1, kind: input, shape index: {}]   ;;  %s281_s2 = inlined_call_operand.vmem [shape: f32[1,128], index: 2, kind: input, shape index: {}]   ;;  %s282_s3 = inlined_call_operand.hbm [shape: f32[32,128], index: 3, kind: output, shape index: {}]  }
   0x1   :  { %v24_v0 = vld [vmem:[%s280_s1 + $0x28] sm:$0xff]  ;;  %v23_v1 = vld [vmem:[%s280_s1 + $0x20] sm:$0xff]  ;;  %v22_v2 = vld [vmem:[%s280_s1 + $0x18] sm:$0xff] }
   0x2   :  { %165 = vmatprep.subr.mxu0 %v24_v0  ;;  %183 = vmatprep.subr.mxu1 %v24_v0 }
   0x3   :  { %166 = vmatpush3.msra.mxu0 %v24_v0  ;;  %189 = vmatpush3.msra.mxu1 %v24_v0 }
   0x4   :  { %167 = vmatprep.subr.mxu0 %v23_v1  ;;  %184 = vmatprep.subr.mxu1 %v23_v1 }
   0x5   :  { %8 = vsyncpa [#allocation3], 0  ;;  %168 = vmatpush3.msra.mxu0 %v23_v1  ;;  %190 = vmatpush3.msra.mxu1 %v23_v1  ;;  %v21_v3 = vld [vmem:[%s280_s1 + $0x10] sm:$0xff]  ;;  %v20_v4 = vld [vmem:[%s280_s1 + $0x8] sm:$0xff]  ;;  %vm32_vm0 = vcmask 392192   ;;  %s220_s6 = smov [#allocation2]  }
   0x6   :  { %169 = vmatprep.subr.mxu0 %v22_v2  ;;  %185 = vmatprep.subr.mxu1 %v22_v2  ;;  %v19_v5 = vld [vmem:[%s280_s1] sm:$0xff]  ;;  %v17_v7 = vld [vmem:[%s279_s0 + $0x10] sm:$0xff]  ;;  %v16_v8 = vld [vmem:[%s279_s0 + $0x8] sm:$0xff]  ;;  %s139_s7 = sshll.u32 %s220_s6, 4  ;;  %s140_s7 = int_to_ptr.vmem [resolvable:$true] %s139_s7 }
   0x7   :  { %170 = vmatpush3.msra.mxu0 %v22_v2  ;;  %191 = vmatpush3.msra.mxu1 %v22_v2  ;;  %v15_v6 = vld [vmem:[%s279_s0] sm:$0xff]  ;;  %v18_v9 = vld [vmem:[%s279_s0 + $0x18] sm:$0xff]  ;;  %s198_s0 = scalar_lea.vmem %s140_s7, 512  ;;  %p203_p1 = scmp.lt.s32.totalorder %s140_s7, %s140_s7 }
   0x8   :  { %171 = vmatprep.subr.mxu0 %v21_v3  ;;  %186 = vmatprep.subr.mxu1 %v21_v3  ;;  %v150_v10 = vld [vmem:[%s281_s2] ss:$0 sm:$0xff]  ;;  %p199_p0 = scmp.ne.s32.totalorder %s140_s7, %s198_s0  ;;  %p204_p2 = scmp.lt.s32.totalorder %s198_s0, %s198_s0 }
   0x9   :  { %172 = vmatpush3.msra.mxu0 %v21_v3  ;;  %192 = vmatpush3.msra.mxu1 %v21_v3 }
   0xa   :  { %173 = vmatprep.subr.mxu0 %v20_v4  ;;  %187 = vmatprep.subr.mxu1 %v20_v4  ;;  %p205_p3 = por %p204_p2, %p203_p1 }
   0xb   :  { %174 = vmatpush3.msra.mxu0 %v20_v4  ;;  %193 = vmatpush3.msra.mxu1 %v20_v4 }
   0xc   :  { %175 = vmatprep.subr.mxu0 %v19_v5  ;;  %188 = vmatprep.subr.mxu1 %v19_v5  ;;  %p206_p4 = pnand %p205_p3, %p199_p0 }
   0xd   :  { %176 = vmatpush3.msra.mxu0 %v19_v5  ;;  %194 = vmatpush3.msra.mxu1 %v19_v5 }
   0xe   :  { %177 = vmatprep.mubr.msk.f32.mxu0 %vm32_vm0, %v15_v6  ;;  %180 = vmatprep.mubr.msk.f32.mxu1 %vm32_vm0, %v17_v7 }
   0xf   :  { %178 = vmatmul.mubr.msk.f32.vlgmr.msra.gmra.mxu0 %vm32_vm0, %v16_v8  ;;  %181 = vmatmul.mubr.msk.f32.vlgmr.msra.gmra.mxu1 %vm32_vm0, %v18_v9 }
  0xcf   :  { %v179_v11 = vpop.f32.mrf.mxu0  ;;  %v182_v12 = vpop.f32.mrf.mxu1 }
  0xd0   :  { %v117_v13 = vadd.f32 %v179_v11, %v150_v10  ;;  %v127_v14 = vadd.f32 %v182_v12, %v150_v10 }
  0xd1   :  { %v111_v15 = vpop.f32.mrf.mxu0  ;;  %v121_v16 = vpop.f32.mrf.mxu1 }
  0xd2   :  { %131 = vst [vmem:[#allocation2 + $0x8] sm:$0xff] %v117_v13  ;;  %133 = vst [vmem:[#allocation2 + $0x18] sm:$0xff] %v127_v14  ;;  %v112_v17 = vadd.f32 %v150_v10, %v111_v15  ;;  %v122_v18 = vadd.f32 %v150_v10, %v121_v16 }
  0xd4   :  { %130 = vst [vmem:[#allocation2] sm:$0xff] %v112_v17  ;;  %132 = vst [vmem:[#allocation2 + $0x10] sm:$0xff] %v122_v18 }
  0xd5   :  { %209 = shalt.err (!%p206_p4)
}
  0xd6   :  { %s221_s2 = smov 128   ;;  %s222_s8 = smov 8  }
  0xd7   :  { %145 = dma.vmem_to_hbm [thread:$0]  %s140_s7, 512, %s282_s3, [#allocation3], %s221_s2, %s221_s2, %s222_s8  }
  0xd8   :  { %218 = dma.done.wait [#allocation3], 512  }
  0xd9   :  { %219 = vsyncadd [#allocation3], 4294966784 }
  0xda   :  { %149 = vsyncpa [#allocation3], 1 }

</bundles_post_ra>
